<compile_context>
chip_gen: v7x
topology: tpu7x:2x2x1
jax: 0.10.0
libtpu: 0.0.40
codegen_flags: <defaults>
</compile_context>

<pallas_src>
import functools
import itertools
import numpy as np

import jax
import jax.numpy as jnp
from jax import lax
from jax.experimental import pallas as pl
from jax.experimental.pallas import tpu as pltpu


def _round_up(x, m):
    return ((x + m - 1) // m) * m


def _mil_kernel(bag_size, n_masks, S_pad, p_ref, y_ref, u_ref, t_ref, o_ref):
    """One grid step = TB bags (bags on lanes, bag positions on sublanes).

    p_ref : (S_pad, TB) f32 instance probs, padded with 0.5
    y_ref : (1, TB)     f32 bag labels (0.0 / 1.0), zero padded
    u_ref : (S_pad, 1)  f32 coefficients A^T w       (zero padded rows)
    t_ref : (S_pad, 1)  f32 coefficients (1-A)^T w   (zero padded rows)
    o_ref : (1, TB)     f32 per-bag loss (one loss per lane)
    """
    p = p_ref[...]                                   # (S_pad, TB)
    log_p = jnp.log(p)
    log_q = jnp.log(1.0 - p)

    # S = sum_j log(1-p_j) over valid bag positions only.  Padded rows hold
    # p = 0.5 (finite logs); mask them out of S.  Padded-row contributions to
    # the Y==1 branch are killed by the zero-padded u/t coefficients instead.
    if bag_size < S_pad:
        row = lax.broadcasted_iota(jnp.int32, p.shape, 0)
        log_q_valid = jnp.where(row < bag_size, log_q, 0.0)
    else:
        log_q_valid = log_q
    S = jnp.sum(log_q_valid, axis=0, keepdims=True)  # (1, TB)

    # Y == 1 branch: sum_a w_a (a.logp + (1-a).logq) == u.logp + t.logq
    loss_y1 = jnp.sum(u_ref[...] * log_p + t_ref[...] * log_q,
                      axis=0, keepdims=True)         # (1, TB)
    # Y == 0 branch: (2^B - 1) * sum(log(1-p))
    loss_y0 = jnp.float32(n_masks) * S               # (1, TB)

    o_ref[...] = jnp.where(y_ref[...] > 0.5, loss_y1, loss_y0)


def mil_loss_pallas(Y, y_prob, w_vec, bag_size):
    """MIL loss.

    Y       : scalar (single bag) or (batch,) bag labels (0/1)
    y_prob  : (bag_size,) or (batch, bag_size) f32 instance probabilities
    w_vec   : (2**bag_size - 1,) f32 weights in itertools.product([0,1], B)
              order with the all-zeros tuple removed (plays the role of
              w_dict); shared across the batch.
    Returns scalar (single bag) or (batch,) f32 loss.
    """
    bag_size = int(bag_size)
    n_masks = 2 ** bag_size - 1
    S_pad = max(8, _round_up(bag_size, 8))           # sublane-aligned bag dim

    y_prob = jnp.asarray(y_prob, jnp.float32)
    single = (y_prob.ndim == 1)
    if single:
        y_prob = y_prob[None, :]
    batch = y_prob.shape[0]
    Y_arr = jnp.asarray(Y, jnp.float32).reshape((batch,))

    # Bags per grid step (lane-dense tile width, multiple of 128).
    TB = 256 if batch >= 256 else 128
    batch_pad = _round_up(max(batch, TB), TB)
    n_tiles = batch_pad // TB

    # Probs laid out (S_pad, batch_pad): bag positions on sublanes, bags on
    # lanes.  Padded entries hold 0.5 so all logs stay finite.
    p_t = jnp.pad(y_prob.T,
                  ((0, S_pad - bag_size), (0, batch_pad - batch)),
                  constant_values=0.5)               # (S_pad, batch_pad)
    y_lane = jnp.pad(Y_arr, (0, batch_pad - batch))[None, :]   # (1, batch_pad)

    # Precompute u = A^T w and t = (1-A)^T w once (A is a compile-time numpy
    # constant in itertools.product order with the all-zeros mask removed).
    masks = list(itertools.product([0, 1], repeat=bag_size))
    masks.remove(tuple([0] * bag_size))
    A_np = np.asarray(masks, np.float32)             # (n_masks, bag_size)
    w = jnp.asarray(w_vec, jnp.float32)
    u = jnp.dot(jnp.asarray(A_np.T), w)              # (bag_size,)
    t = jnp.dot(jnp.asarray(1.0 - A_np.T), w)        # (bag_size,)
    u_col = jnp.pad(u, (0, S_pad - bag_size))[:, None]   # (S_pad, 1)
    t_col = jnp.pad(t, (0, S_pad - bag_size))[:, None]   # (S_pad, 1)

    kernel = functools.partial(_mil_kernel, bag_size, n_masks, S_pad)
    out = pl.pallas_call(
        kernel,
        out_shape=jax.ShapeDtypeStruct((1, batch_pad), jnp.float32),
        grid_spec=pltpu.PrefetchScalarGridSpec(
            num_scalar_prefetch=0,
            grid=(n_tiles,),
            in_specs=[
                pl.BlockSpec((S_pad, TB), lambda b: (0, b)),   # probs tile
                pl.BlockSpec((1, TB), lambda b: (0, b)),       # labels tile
                pl.BlockSpec((S_pad, 1), lambda b: (0, 0)),    # shared u
                pl.BlockSpec((S_pad, 1), lambda b: (0, 0)),    # shared t
            ],
            out_specs=pl.BlockSpec((1, TB), lambda b: (0, b)),
        ),
        compiler_params=pltpu.CompilerParams(
            dimension_semantics=("parallel",)),
    )(p_t, y_lane, u_col, t_col)

    loss = out[0, :batch]
    return loss[0] if single else loss


def mil_loss_reference(Y, y_prob, w_vec, bag_size):
    """Plain numpy transcription of MIL_Loss.forward for verification."""
    A = list(itertools.product([0, 1], repeat=bag_size))
    A.remove(tuple([0] * bag_size))
    logp = np.log(np.asarray(y_prob, np.float64))
    logq = np.log(1.0 - np.asarray(y_prob, np.float64))
    loss = 0.0
    for idx, a in enumerate(A):
        if Y == 1:
            a_f = np.asarray(a, np.float64)
            loss += (logp @ a_f + logq @ (1.0 - a_f)) * float(w_vec[idx])
        else:
            loss += logq.sum()
    return np.float32(loss)


if __name__ == "__main__":
    bag_size = 4                        # small bag -> 15 masks
    n_masks = 2 ** bag_size - 1
    key = jax.random.PRNGKey(0)
    kp, kw, kp2 = jax.random.split(key, 3)

    # deterministic per-instance probabilities in (0, 1)
    batch = 2
    y_prob = jax.random.uniform(kp, (batch, bag_size), jnp.float32,
                                minval=0.05, maxval=0.95)
    # deterministic synthetic weights standing in for w_dict (same ordering
    # as itertools.product([0,1], repeat=bag_size) with all-zeros removed)
    w_vec = jax.random.uniform(kw, (n_masks,), jnp.float32,
                               minval=0.1, maxval=1.0)
    Y = jnp.array([1, 0], jnp.int32)    # one positive bag, one negative bag

    # batched call (both branches in one pallas_call)
    out = jax.block_until_ready(mil_loss_pallas(Y, y_prob, w_vec, bag_size))
    for b in range(batch):
        ref = mil_loss_reference(int(Y[b]), np.asarray(y_prob[b]),
                                 np.asarray(w_vec), bag_size)
        np.testing.assert_allclose(np.asarray(out[b]), ref, rtol=1e-4, atol=1e-4)

    # single-bag path (matches the original module's per-bag signature)
    out1 = jax.block_until_ready(
        mil_loss_pallas(1, y_prob[0], w_vec, bag_size))
    ref1 = mil_loss_reference(1, np.asarray(y_prob[0]), np.asarray(w_vec),
                              bag_size)
    np.testing.assert_allclose(np.asarray(out1), ref1, rtol=1e-4, atol=1e-4)

    # larger batch exercising the multi-tile (grid > 1) path
    batch2 = 130
    y_prob2 = jax.random.uniform(kp2, (batch2, bag_size), jnp.float32,
                                 minval=0.05, maxval=0.95)
    Y2 = (jnp.arange(batch2) % 2).astype(jnp.int32)
    out2 = jax.block_until_ready(mil_loss_pallas(Y2, y_prob2, w_vec, bag_size))
    for b in (0, 1, 64, 127, 128, 129):
        ref = mil_loss_reference(int(Y2[b]), np.asarray(y_prob2[b]),
                                 np.asarray(w_vec), bag_size)
        np.testing.assert_allclose(np.asarray(out2[b]), ref, rtol=1e-4, atol=1e-4)

    print("KERNEL_OK")
</pallas_src>

<mosaic_0001>
module attributes {stable_mosaic.version = 11 : i64} {
  func.func @_mil_kernel(%arg0: i32, %arg1: memref<8x128xf32, #tpu.memory_space<vmem>>, %arg2: memref<1x128xf32, #tpu.memory_space<vmem>>, %arg3: memref<8x1xf32, #tpu.memory_space<vmem>>, %arg4: memref<8x1xf32, #tpu.memory_space<vmem>>, %arg5: memref<1x128xf32, #tpu.memory_space<vmem>>) attributes {dimension_semantics = [#tpu.dimension_semantics<parallel>], iteration_bounds = array<i64: 1>, scalar_prefetch = 0 : i64, scratch_operands = 0 : i64, tpu.core_type = #tpu.core_type<tc>, window_params = [{transform_indices = @transform_0, window_bounds = array<i64: 8, 128>}, {transform_indices = @transform_1, window_bounds = array<i64: 1, 128>}, {pipeline_mode = #tpu.pipeline_mode<synchronous>, transform_indices = @transform_2, window_bounds = array<i64: 8, 1>}, {pipeline_mode = #tpu.pipeline_mode<synchronous>, transform_indices = @transform_3, window_bounds = array<i64: 8, 1>}, {transform_indices = @transform_4, window_bounds = array<i64: 1, 128>}]} {
    %c0 = arith.constant 0 : index
    %c0_0 = arith.constant 0 : index
    %0 = vector.load %arg1[%c0, %c0_0] : memref<8x128xf32, #tpu.memory_space<vmem>>, vector<8x128xf32>
    %1 = math.log %0 : vector<8x128xf32>
    %cst = arith.constant 1.000000e+00 : f32
    %2 = vector.broadcast %cst : f32 to vector<8x128xf32>
    %3 = arith.subf %2, %0 : vector<8x128xf32>
    %4 = math.log %3 : vector<8x128xf32>
    %5 = tpu.iota {dimensions = array<i32: 0>} : vector<8x128xi32>
    %c4_i32 = arith.constant 4 : i32
    %6 = vector.broadcast %c4_i32 : i32 to vector<8x128xi32>
    %7 = arith.cmpi slt, %5, %6 : vector<8x128xi32>
    %cst_1 = arith.constant 0.000000e+00 : f32
    %8 = vector.broadcast %cst_1 : f32 to vector<8x128xf32>
    %9 = arith.select %7, %4, %8 : vector<8x128xi1>, vector<8x128xf32>
    %cst_2 = arith.constant dense<0.000000e+00> : vector<128xf32>
    %10 = vector.multi_reduction <add>, %9, %cst_2 [0] : vector<8x128xf32> to vector<128xf32>
    %11 = vector.shape_cast %10 : vector<128xf32> to vector<1x128xf32>
    %c0_3 = arith.constant 0 : index
    %c0_4 = arith.constant 0 : index
    %12 = vector.load %arg3[%c0_3, %c0_4] : memref<8x1xf32, #tpu.memory_space<vmem>>, vector<8x1xf32>
    %13 = vector.broadcast %12 : vector<8x1xf32> to vector<8x128xf32>
    %14 = arith.mulf %13, %1 : vector<8x128xf32>
    %c0_5 = arith.constant 0 : index
    %c0_6 = arith.constant 0 : index
    %15 = vector.load %arg4[%c0_5, %c0_6] : memref<8x1xf32, #tpu.memory_space<vmem>>, vector<8x1xf32>
    %16 = vector.broadcast %15 : vector<8x1xf32> to vector<8x128xf32>
    %17 = arith.mulf %16, %4 : vector<8x128xf32>
    %18 = arith.addf %14, %17 : vector<8x128xf32>
    %cst_7 = arith.constant dense<0.000000e+00> : vector<128xf32>
    %19 = vector.multi_reduction <add>, %18, %cst_7 [0] : vector<8x128xf32> to vector<128xf32>
    %20 = vector.shape_cast %19 : vector<128xf32> to vector<1x128xf32>
    %cst_8 = arith.constant 1.500000e+01 : f32
    %21 = vector.broadcast %cst_8 : f32 to vector<1x128xf32>
    %22 = arith.mulf %21, %11 : vector<1x128xf32>
    %c0_9 = arith.constant 0 : index
    %c0_10 = arith.constant 0 : index
    %23 = vector.load %arg2[%c0_9, %c0_10] : memref<1x128xf32, #tpu.memory_space<vmem>>, vector<1x128xf32>
    %cst_11 = arith.constant 5.000000e-01 : f32
    %24 = vector.broadcast %cst_11 : f32 to vector<1x128xf32>
    %25 = arith.cmpf ogt, %23, %24 : vector<1x128xf32>
    %26 = arith.select %25, %20, %22 : vector<1x128xi1>, vector<1x128xf32>
    %c0_12 = arith.constant 0 : index
    %c0_13 = arith.constant 0 : index
    %27 = vector.load %arg5[%c0_12, %c0_13] : memref<1x128xf32, #tpu.memory_space<vmem>>, vector<1x128xf32>
    tpu.vector_store %arg5[%c0_12, %c0_13], %26 {strides = array<i32>} : memref<1x128xf32, #tpu.memory_space<vmem>>, vector<1x128xf32>,
    return
  }
  func.func @transform_0(%arg0: i32) -> (i32, i32) {
    %c0_i32 = arith.constant 0 : i32
    %c0_i32_0 = arith.constant 0 : i32
    return %c0_i32, %arg0 : i32, i32
  }
  func.func @transform_1(%arg0: i32) -> (i32, i32) {
    %c0_i32 = arith.constant 0 : i32
    %c0_i32_0 = arith.constant 0 : i32
    return %c0_i32, %arg0 : i32, i32
  }
  func.func @transform_2(%arg0: i32) -> (i32, i32) {
    %c0_i32 = arith.constant 0 : i32
    %c0_i32_0 = arith.constant 0 : i32
    %c0_i32_1 = arith.constant 0 : i32
    return %c0_i32, %c0_i32_0 : i32, i32
  }
  func.func @transform_3(%arg0: i32) -> (i32, i32) {
    %c0_i32 = arith.constant 0 : i32
    %c0_i32_0 = arith.constant 0 : i32
    %c0_i32_1 = arith.constant 0 : i32
    return %c0_i32, %c0_i32_0 : i32, i32
  }
  func.func @transform_4(%arg0: i32) -> (i32, i32) {
    %c0_i32 = arith.constant 0 : i32
    %c0_i32_0 = arith.constant 0 : i32
    return %c0_i32, %arg0 : i32, i32
  }
}

</mosaic_0001>

<bundles_post_ra>
// kernel: tpu_custom_call.1
= control target key start
LH: loop header
LB: loop body
LE: loop exit
PB: predicated region body
PF: predicated region fallthrough
CT: control target
= control target key end

     0   :  { %v105_v1 = vmov 0   ;;  %s156_s0 = inlined_call_operand.vmem [shape: f32[8,128], index: 0, kind: input, shape index: {}]   ;;  %s157_s1 = inlined_call_operand.vmem [shape: f32[1,128], index: 1, kind: input, shape index: {}]   ;;  %s158_s2 = inlined_call_operand.vmem [shape: f32[8,1], index: 2, kind: input, shape index: {}]   ;;  %s159_s3 = inlined_call_operand.vmem [shape: f32[8,1], index: 3, kind: input, shape index: {}]   ;;  %s160_s4 = inlined_call_operand.hbm [shape: f32[1,128], index: 4, kind: output, shape index: {}]  }
   0x1   :  { %v34_v0 = vld [vmem:[%s158_s2] sm:$0xff]  ;;  %76 = vset.pattern.permute.xlu0 %v105_v1 }
   0x2   :  { %9 = vsyncpa [#allocation3], 0  ;;  %37 = vperm.xlu0 %76, %v34_v0   ;;  %v41_v2 = vld [vmem:[%s159_s3] sm:$0xff]  ;;  %v24_v5 = vlaneseq  ;;  %s106_s3 = smov [#allocation2]  }
   0x3   :  { %v18_v3 = vld [vmem:[%s156_s0] sm:$0xff]  ;;  %s66_s21 = sshll.u32 %s106_s3, 4  ;;  %s67_s21 = int_to_ptr.vmem [resolvable:$true] %s66_s21 }
   0x4   :  { %v21_v4 = vsub.f32 1.0, %v18_v3  ;;  %v25_v7 = vshrl.u32 %v24_v5, 7  ;;  %v56_v27 = vld [vmem:[%s157_s1] sm:$0x1]  ;;  %s81_s22 = scalar_lea.vmem %s67_s21, 16  ;;  %s85_s23 = scalar_lea.vmem %s67_s21, 32 }
   0x5   :  { %vm57_vm1 = vcmp.gt.f32.partialorder %v56_v27, 0.5  ;;  %p82_p0 = scmp.ne.s32.totalorder %s67_s21, %s81_s22  ;;  %p86_p1 = scmp.lt.s32.totalorder %s67_s21, %s67_s21 }
   0x6   :  { %44 = vperm.xlu0 %76, %v41_v2   ;;  %77 = vlog2.f32 %v21_v4  ;;  %vm26_vm0 = vcmp.lt.s32.totalorder %v25_v7, 4  ;;  %p87_p2 = scmp.lt.s32.totalorder %s85_s23, %s81_s22 }
   0x7   :  { %79 = vlog2.f32 %v18_v3 }
   0x8   :  { %p88_p3 = por %p87_p2, %p86_p1 }
   0xa   :  { %p89_p4 = pnand %p88_p3, %p82_p0 }
  0x10   :  { %v78_v6 = vpop.eup %77 }
  0x11   :  { %v23_v8 = vmul.f32 0.6931472, %v78_v6  ;;  %v80_v12 = vpop.eup %79 }
  0x12   :  { %v20_v14 = vmul.f32 0.6931472, %v80_v12 }
  0x13   :  { %v27_v9 = vsel %vm26_vm0, %v23_v8, 0.0 }
  0x14   :  { %v28_v10 = vrot.slane %v27_v9, 4 }
  0x16   :  { %v29_v11 = vadd.f32 %v28_v10, %v27_v9 }
  0x18   :  { %v30_v15 = vrot.slane %v29_v11, 2 }
  0x1a   :  { %v31_v18 = vadd.f32 %v30_v15, %v29_v11 }
  0x1c   :  { %v32_v22 = vrot.slane %v31_v18, 1 }
  0x1e   :  { %v33_v25 = vadd.f32 %v32_v22, %v31_v18 }
  0x20   :  { %v55_v29 = vmul.f32 15.0, %v33_v25 }
  0x81   :  { %v38_v13 = vpop.permute.xlu0 %37 }
  0x82   :  { %v40_v17 = vmul.f32 %v38_v13, %v20_v14 }
  0x85   :  { %v45_v16 = vpop.permute.xlu0 %44 }
  0x86   :  { %v47_v19 = vmul.f32 %v45_v16, %v23_v8 }
  0x88   :  { %v48_v20 = vadd.f32 %v47_v19, %v40_v17 }
  0x8a   :  { %v49_v21 = vrot.slane %v48_v20, 4 }
  0x8c   :  { %v50_v23 = vadd.f32 %v49_v21, %v48_v20 }
  0x8e   :  { %v51_v24 = vrot.slane %v50_v23, 2 }
  0x90   :  { %v52_v26 = vadd.f32 %v51_v24, %v50_v23 }
  0x92   :  { %v53_v28 = vrot.slane %v52_v26, 1 }
  0x94   :  { %v54_v30 = vadd.f32 %v53_v28, %v52_v26 }
  0x96   :  { %v58_v31 = vsel %vm57_vm1, %v54_v30, %v55_v29 }
  0x97   :  { %59 = vst [vmem:[#allocation2] sm:$0x1] %v58_v31 }
  0x98   :  { %92 = shalt.err (!%p89_p4)
}
  0x99   :  { %s93_s1 = scalar_lea.hbm %s160_s4, 16 }
  0x9a   :  { %p94_p5 = scmp.ne.s32.totalorder %s160_s4, %s93_s1  ;;  %p97_p6 = scmp.lt.u32.totalorder %s93_s1, %s160_s4 }
  0x9c   :  { %p99_p7 = pnand %p97_p6, %p94_p5 }
  0x9e   :  { %102 = shalt.err (!%p99_p7)
}
  0x9f   :  { %69 = dma.vmem_to_hbm [thread:$0]  %s67_s21, 16, %s160_s4, [#allocation3]  }
  0xa0   :  { %103 = dma.done.wait [#allocation3], 16  }
  0xa1   :  { %104 = vsyncadd [#allocation3], 4294967280 }
  0xa2   :  { %73 = vsyncpa [#allocation3], 1 }

</bundles_post_ra>
